<compile_context>
chip_gen: v6e
topology: v6e:2x2x1
jax: 0.10.0
libtpu: 0.0.40
codegen_flags: <defaults>
</compile_context>

<pallas_src>
import math

import jax
import jax.numpy as jnp
from jax import lax
from jax.experimental import pallas as pl
from jax.experimental.pallas import tpu as pltpu


_SQRT_HALF = 0.7071067811865476


def _gelu_exact(x):
    # Matches torch.nn.functional.gelu default (erf-based); x is f32.
    # TODO(synk): once DMA is efficient and hidden is large, the erf
    # polynomial can saturate the VALU slot; a tanh-approx GELU would move the
    # transcendental to the EUP slot but changes semantics vs torch's default.
    return 0.5 * x * (1.0 + lax.erf(x * _SQRT_HALF))


def _make_ffn_kernel(hidden, hidden_chunk):
    """Builds the kernel body with optional static hidden-dim chunking."""
    if (hidden_chunk is not None and hidden > hidden_chunk
            and hidden % hidden_chunk == 0 and hidden_chunk % 256 == 0):
        hc, n_chunks = hidden_chunk, hidden // hidden_chunk
    else:
        hc, n_chunks = hidden, 1

    def kernel(x_ref, y_ref, wR_ref, bR_ref, wS_ref, bS_ref, wO_ref, bO_ref,
               o_ref):
        cdt = wR_ref.dtype                    # MXU compute dtype (bf16 or f32)
        x = x_ref[0]                          # (dim, TP)
        y = y_ref[0]
        if x.dtype != cdt:                    # no-op when fed bf16 upstream
            x = x.astype(cdt)
        if y.dtype != cdt:
            y = y.astype(cdt)

        # TODO(synk): for tiny dim the two input projections could be fused
        # into one block-diagonal matmul over concat(x, y) to halve MXU
        # push/drain overhead; irrelevant while HBM-bound.
        def chunk_out(c0):
            # project_in_R / project_in_S: 1x1 conv == channel matmul,
            # f32 accumulation; GELU gating stays in f32.
            r = jnp.dot(wR_ref[c0:c0 + hc, :], x,
                        preferred_element_type=jnp.float32) + bR_ref[c0:c0 + hc, :]
            s = jnp.dot(wS_ref[c0:c0 + hc, :], y,
                        preferred_element_type=jnp.float32) + bS_ref[c0:c0 + hc, :]
            h = _gelu_exact(r) * _gelu_exact(s)            # (hc, TP), f32
            return jnp.dot(wO_ref[:, c0:c0 + hc], h.astype(cdt),
                           preferred_element_type=jnp.float32)

        out = chunk_out(0)
        for c in range(1, n_chunks):                        # static, 256-aligned
            out = out + chunk_out(c * hc)
        out = out + bO_ref[...]                             # (dim,1) broadcast
        o_ref[0] = out.astype(o_ref.dtype)                  # lane-dense store

    return kernel, hc


def prepare_params(params, compute_dtype=jnp.bfloat16):
    """One-time weight prep (hoisted out of the per-call path): squeeze the
    1x1 conv kernels and cast them for the MXU; biases stay f32."""
    wR, bR, wS, bS, wO, bO = params
    hidden, dim = wR.shape[0], wR.shape[1]
    return (
        wR[:, :, 0, 0].astype(compute_dtype),          # (hidden, dim)
        bR.reshape(hidden, 1).astype(jnp.float32),     # (hidden, 1)
        wS[:, :, 0, 0].astype(compute_dtype),          # (hidden, dim)
        bS.reshape(hidden, 1).astype(jnp.float32),     # (hidden, 1)
        wO[:, :, 0, 0].astype(compute_dtype),          # (dim, hidden)
        bO.reshape(dim, 1).astype(jnp.float32),        # (dim, 1)
    )


def _chip_vmem_bytes():
    # Per-generation sizing: v5e/v6e report 128 MiB, v7x 64 MiB per TC.
    # Sizing heuristic only -- never affects correctness -- so a broad
    # fallback to a conservative (v7x) value is safe here.
    try:
        v = int(pltpu.get_tpu_info().vmem_capacity_bytes)
        if v > 0:
            return v
    except Exception:
        pass
    return 64 << 20


def _pick_pixel_tile(hw, n, dim, hc_live, in_isz, out_isz, vmem_cap,
                     max_tile=None, budget_bytes=None):
    if budget_bytes is None:
        # ~48 MiB on 128 MiB chips (v5e/v6e), ~24 MiB on v7x's 64 MiB.
        budget_bytes = max(8 << 20, (vmem_cap * 3) // 8)
    if max_tile is None:
        max_tile = 8192 if vmem_cap >= (96 << 20) else 4096
    # Steady-state VMEM bytes per pixel column.
    per_col = (2 * 2 * dim * in_isz      # x, y double-buffered
               + 2 * dim * out_isz       # out double-buffered
               + 3 * hc_live * 4         # r, s, h for one live hidden chunk (f32)
               + 2 * dim * 4)            # f32 accumulator / pre-cast out
    tp = min(max_tile, budget_bytes // max(per_col, 1))
    if hw <= tp:
        tp = int(hw)                     # full extent: always a legal last dim
    else:
        align = 256 if tp >= 256 else 128   # 256-wide MXU N-dim on v6e/v7x
        tp = max(128, (tp // align) * align)
    # v7x megacore: keep >=2 grid steps so both TensorCores get work.
    if n * pl.cdiv(hw, tp) < 2 and hw >= 256 and tp >= 256:
        tp = max(128, (((hw + 1) // 2 + 127) // 128) * 128)
    return int(tp)


def _vmem_limit_bytes(tp, dim, hidden, hc_live, in_isz, out_isz, w_isz, vmem_cap):
    weights = 2 * (3 * hidden * dim * w_isz + (2 * hidden + dim) * 4)
    pipelined = 2 * 2 * dim * tp * in_isz + 2 * dim * tp * out_isz
    interm = (3 * hc_live + 2 * dim) * tp * 4
    est = weights + pipelined + interm
    # Headroom for Mosaic internal scratch: cap ~40 MiB on v7x (64 MiB/TC),
    # >=104 MiB on v5e/v6e (128 MiB physical).
    cap = max(16 << 20, vmem_cap - (24 << 20))
    return int(min(max(16 << 20, est * 3 // 2 + (4 << 20)), cap))


def feedforward_pallas(x_nchw, y_nchw, prepared_params, *, pixel_tile=None,
                       hidden_chunk=256, out_dtype=None):
    """x_nchw, y_nchw: (N, dim, H, W).  prepared_params from prepare_params().
    Feeding x/y (and choosing out_dtype) in bf16 halves HBM traffic for this
    HBM-bound kernel; the in-kernel cast then becomes a no-op.
    Returns (N, dim, H, W) in out_dtype (defaults to the input dtype)."""
    wR, bR, wS, bS, wO, bO = prepared_params
    N, dim, H, W = x_nchw.shape
    hidden = wR.shape[0]
    hw = H * W
    if out_dtype is None:
        out_dtype = x_nchw.dtype

    # Free views -- no transpose, no pad, no extra HBM traffic.
    x3 = x_nchw.reshape(N, dim, hw)
    y3 = y_nchw.reshape(N, dim, hw)

    kernel, hc_live = _make_ffn_kernel(hidden, hidden_chunk)

    in_isz = jnp.dtype(x_nchw.dtype).itemsize
    out_isz = jnp.dtype(out_dtype).itemsize
    w_isz = jnp.dtype(wR.dtype).itemsize
    vmem_cap = _chip_vmem_bytes()

    if pixel_tile is None:
        tp = _pick_pixel_tile(hw, N, dim, hc_live, in_isz, out_isz, vmem_cap)
    else:
        tp = int(min(pixel_tile, hw))
    grid = (N, pl.cdiv(hw, tp))
    vmem_limit = _vmem_limit_bytes(tp, dim, hidden, hc_live, in_isz, out_isz,
                                   w_isz, vmem_cap)

    def wspec(shape):
        # Grid-invariant (resident) operand: constant index map, fetched once.
        # TODO(synk): pl.Buffered(1) would halve weight VMEM; skipped to avoid
        # the fragile fallback path flagged in review (weights are tiny).
        return pl.BlockSpec(shape, lambda n, p: (0, 0))

    # TODO(synk): on v5e, if profiles show exposed input DMA, consider
    # pipeline_mode=pl.Buffered(3) on these x/y specs (ample 128 MiB VMEM).
    io_spec = pl.BlockSpec((1, dim, tp), lambda n, p: (n, 0, p))

    out3 = pl.pallas_call(
        kernel,
        out_shape=jax.ShapeDtypeStruct((N, dim, hw), out_dtype),
        grid_spec=pltpu.PrefetchScalarGridSpec(
            num_scalar_prefetch=0,
            grid=grid,
            in_specs=[
                io_spec,                     # x pixel tiles
                io_spec,                     # y pixel tiles
                wspec((hidden, dim)),        # wR
                wspec((hidden, 1)),          # bR
                wspec((hidden, dim)),        # wS
                wspec((hidden, 1)),          # bS
                wspec((dim, hidden)),        # wO
                wspec((dim, 1)),             # bO
            ],
            out_specs=pl.BlockSpec((1, dim, tp), lambda n, p: (n, 0, p)),
        ),
        compiler_params=pltpu.CompilerParams(
            dimension_semantics=("parallel", "parallel"),
            vmem_limit_bytes=vmem_limit,
        ),
    )(x3, y3, wR, bR, wS, bS, wO, bO)
    return out3.reshape(N, dim, H, W)


def init_params(key, dim, ffn_expansion_factor, bias=True):
    hidden = int(dim * ffn_expansion_factor)
    ks = jax.random.split(key, 6)

    def conv_w(k, out_c, in_c):
        bound = 1.0 / math.sqrt(in_c)
        return jax.random.uniform(k, (out_c, in_c, 1, 1), jnp.float32, -bound, bound)

    def conv_b(k, out_c, in_c):
        bound = 1.0 / math.sqrt(in_c)
        return jax.random.uniform(k, (out_c,), jnp.float32, -bound, bound)

    wR = conv_w(ks[0], hidden, dim)
    bR = conv_b(ks[1], hidden, dim) if bias else jnp.zeros((hidden,), jnp.float32)
    wS = conv_w(ks[2], hidden, dim)
    bS = conv_b(ks[3], hidden, dim) if bias else jnp.zeros((hidden,), jnp.float32)
    wO = conv_w(ks[4], dim, hidden)
    bO = conv_b(ks[5], dim, hidden) if bias else jnp.zeros((dim,), jnp.float32)
    return (wR, bR, wS, bS, wO, bO)


def _reference(x, y, params):
    """Pure-JAX reference of the PyTorch forward (NCHW, 1x1 convs, erf GELU)."""
    wR, bR, wS, bS, wO, bO = params

    def conv1x1(a, w, b):
        out = jnp.einsum('nchw,oc->nohw', a, w[:, :, 0, 0])
        return out + b[None, :, None, None]

    r = conv1x1(x, wR, bR)
    s = conv1x1(y, wS, bS)
    g = jax.nn.gelu(r, approximate=False) * jax.nn.gelu(s, approximate=False)
    return conv1x1(g, wO, bO)


if __name__ == "__main__":
    key = jax.random.PRNGKey(0)
    k_x, k_y, k_p, k_x2, k_y2, k_p2 = jax.random.split(key, 6)

    # --- Config 1: the module's demo shape (dim=4, hidden=8). --------------
    N, dim, H, W = 2, 4, 16, 16
    ffn_expansion_factor = 2                         # hidden = 8
    x = jax.random.normal(k_x, (N, dim, H, W), jnp.float32)
    y = jax.random.normal(k_y, (N, dim, H, W), jnp.float32)
    params = init_params(k_p, dim, ffn_expansion_factor, bias=True)
    ref = _reference(x, y, params)

    # f32 compute path: tight check against the reference.
    out_f32 = jax.block_until_ready(
        feedforward_pallas(x, y, prepare_params(params, jnp.float32)))
    assert out_f32.shape == (N, dim, H, W)
    assert jnp.allclose(out_f32, ref, atol=1e-4, rtol=1e-4), \
        f"f32 max err {jnp.max(jnp.abs(out_f32 - ref))}"

    # bf16-MXU path (f32 accumulation + f32 gating): looser tolerance.
    out_bf16 = jax.block_until_ready(
        feedforward_pallas(x, y, prepare_params(params, jnp.bfloat16)))
    assert out_bf16.shape == (N, dim, H, W)
    assert jnp.allclose(out_bf16, ref, atol=5e-2, rtol=5e-2), \
        f"bf16 max err {jnp.max(jnp.abs(out_bf16 - ref))}"

    # --- Config 2: larger hidden exercising in-kernel hidden chunking. -----
    N2, dim2, H2, W2 = 1, 8, 16, 16
    ffn2 = 64                                        # hidden = 512 -> 2 chunks of 256
    x2 = jax.random.normal(k_x2, (N2, dim2, H2, W2), jnp.float32)
    y2 = jax.random.normal(k_y2, (N2, dim2, H2, W2), jnp.float32)
    params2 = init_params(k_p2, dim2, ffn2, bias=True)
    ref2 = _reference(x2, y2, params2)

    out2_f32 = jax.block_until_ready(
        feedforward_pallas(x2, y2, prepare_params(params2, jnp.float32),
                           hidden_chunk=256))
    assert out2_f32.shape == (N2, dim2, H2, W2)
    assert jnp.allclose(out2_f32, ref2, atol=1e-4, rtol=1e-4), \
        f"chunked f32 max err {jnp.max(jnp.abs(out2_f32 - ref2))}"

    # Fully bf16-fed path (activations, weights and output all bf16): the big
    # HBM-bandwidth lever.  Compare against a bf16-input f32 reference.
    x2_bf, y2_bf = x2.astype(jnp.bfloat16), y2.astype(jnp.bfloat16)
    ref2_bf = _reference(x2_bf.astype(jnp.float32), y2_bf.astype(jnp.float32),
                         params2)
    out2_bf = jax.block_until_ready(
        feedforward_pallas(x2_bf, y2_bf, prepare_params(params2, jnp.bfloat16),
                           hidden_chunk=256, out_dtype=jnp.bfloat16))
    assert out2_bf.shape == (N2, dim2, H2, W2)
    assert out2_bf.dtype == jnp.bfloat16
    err = jnp.max(jnp.abs(out2_bf.astype(jnp.float32) - ref2_bf))
    assert jnp.allclose(out2_bf.astype(jnp.float32), ref2_bf,
                        atol=1e-1, rtol=1e-1), f"chunked bf16 max err {err}"

    print("KERNEL_OK")
</pallas_src>

<mosaic_0001>
module attributes {stable_mosaic.version = 11 : i64} {
  func.func @kernel(%arg0: i32, %arg1: i32, %arg2: memref<1x4x256xf32, #tpu.memory_space<vmem>>, %arg3: memref<1x4x256xf32, #tpu.memory_space<vmem>>, %arg4: memref<8x4xf32, #tpu.memory_space<vmem>>, %arg5: memref<8x1xf32, #tpu.memory_space<vmem>>, %arg6: memref<8x4xf32, #tpu.memory_space<vmem>>, %arg7: memref<8x1xf32, #tpu.memory_space<vmem>>, %arg8: memref<4x8xf32, #tpu.memory_space<vmem>>, %arg9: memref<4x1xf32, #tpu.memory_space<vmem>>, %arg10: memref<1x4x256xf32, #tpu.memory_space<vmem>>) attributes {dimension_semantics = [#tpu.dimension_semantics<parallel>, #tpu.dimension_semantics<parallel>], iteration_bounds = array<i64: 2, 1>, scalar_prefetch = 0 : i64, scratch_operands = 0 : i64, tpu.core_type = #tpu.core_type<tc>, window_params = [{transform_indices = @transform_0, window_bounds = array<i64: 1, 4, 256>}, {transform_indices = @transform_1, window_bounds = array<i64: 1, 4, 256>}, {pipeline_mode = #tpu.pipeline_mode<synchronous>, transform_indices = @transform_2, window_bounds = array<i64: 8, 4>}, {pipeline_mode = #tpu.pipeline_mode<synchronous>, transform_indices = @transform_3, window_bounds = array<i64: 8, 1>}, {pipeline_mode = #tpu.pipeline_mode<synchronous>, transform_indices = @transform_4, window_bounds = array<i64: 8, 4>}, {pipeline_mode = #tpu.pipeline_mode<synchronous>, transform_indices = @transform_5, window_bounds = array<i64: 8, 1>}, {pipeline_mode = #tpu.pipeline_mode<synchronous>, transform_indices = @transform_6, window_bounds = array<i64: 4, 8>}, {pipeline_mode = #tpu.pipeline_mode<synchronous>, transform_indices = @transform_7, window_bounds = array<i64: 4, 1>}, {transform_indices = @transform_8, window_bounds = array<i64: 1, 4, 256>}]} {
    %c0 = arith.constant 0 : index
    %c0_0 = arith.constant 0 : index
    %c0_1 = arith.constant 0 : index
    %0 = vector.load %arg2[%c0, %c0_0, %c0_1] : memref<1x4x256xf32, #tpu.memory_space<vmem>>, vector<1x4x256xf32>
    %1 = vector.shape_cast %0 : vector<1x4x256xf32> to vector<4x256xf32>
    %c0_2 = arith.constant 0 : index
    %c0_3 = arith.constant 0 : index
    %c0_4 = arith.constant 0 : index
    %2 = vector.load %arg3[%c0_2, %c0_3, %c0_4] : memref<1x4x256xf32, #tpu.memory_space<vmem>>, vector<1x4x256xf32>
    %3 = vector.shape_cast %2 : vector<1x4x256xf32> to vector<4x256xf32>
    %c0_5 = arith.constant 0 : index
    %c0_6 = arith.constant 0 : index
    %4 = vector.load %arg4[%c0_5, %c0_6] : memref<8x4xf32, #tpu.memory_space<vmem>>, vector<8x4xf32>
    %cst = arith.constant dense<0.000000e+00> : vector<8x256xf32>
    %5 = tpu.matmul %4, %1, %cst {dimension_numbers = #tpu.dot_dimension_numbers<[1], [0], [0], [1], [0, 0, 1, 1], [], []>} : vector<8x4xf32>, vector<4x256xf32>, vector<8x256xf32> -> vector<8x256xf32>
    %c0_7 = arith.constant 0 : index
    %c0_8 = arith.constant 0 : index
    %6 = vector.load %arg5[%c0_7, %c0_8] : memref<8x1xf32, #tpu.memory_space<vmem>>, vector<8x1xf32>
    %7 = vector.broadcast %6 : vector<8x1xf32> to vector<8x256xf32>
    %8 = arith.addf %5, %7 : vector<8x256xf32>
    %c0_9 = arith.constant 0 : index
    %c0_10 = arith.constant 0 : index
    %9 = vector.load %arg6[%c0_9, %c0_10] : memref<8x4xf32, #tpu.memory_space<vmem>>, vector<8x4xf32>
    %cst_11 = arith.constant dense<0.000000e+00> : vector<8x256xf32>
    %10 = tpu.matmul %9, %3, %cst_11 {dimension_numbers = #tpu.dot_dimension_numbers<[1], [0], [0], [1], [0, 0, 1, 1], [], []>} : vector<8x4xf32>, vector<4x256xf32>, vector<8x256xf32> -> vector<8x256xf32>
    %c0_12 = arith.constant 0 : index
    %c0_13 = arith.constant 0 : index
    %11 = vector.load %arg7[%c0_12, %c0_13] : memref<8x1xf32, #tpu.memory_space<vmem>>, vector<8x1xf32>
    %12 = vector.broadcast %11 : vector<8x1xf32> to vector<8x256xf32>
    %13 = arith.addf %10, %12 : vector<8x256xf32>
    %cst_14 = arith.constant 5.000000e-01 : f32
    %14 = vector.broadcast %cst_14 : f32 to vector<8x256xf32>
    %15 = arith.mulf %14, %8 : vector<8x256xf32>
    %cst_15 = arith.constant 0.707106769 : f32
    %16 = vector.broadcast %cst_15 : f32 to vector<8x256xf32>
    %17 = arith.mulf %8, %16 : vector<8x256xf32>
    %18 = math.erf %17 : vector<8x256xf32>
    %cst_16 = arith.constant 1.000000e+00 : f32
    %19 = vector.broadcast %cst_16 : f32 to vector<8x256xf32>
    %20 = arith.addf %19, %18 : vector<8x256xf32>
    %21 = arith.mulf %15, %20 : vector<8x256xf32>
    %cst_17 = arith.constant 5.000000e-01 : f32
    %22 = vector.broadcast %cst_17 : f32 to vector<8x256xf32>
    %23 = arith.mulf %22, %13 : vector<8x256xf32>
    %cst_18 = arith.constant 0.707106769 : f32
    %24 = vector.broadcast %cst_18 : f32 to vector<8x256xf32>
    %25 = arith.mulf %13, %24 : vector<8x256xf32>
    %26 = math.erf %25 : vector<8x256xf32>
    %cst_19 = arith.constant 1.000000e+00 : f32
    %27 = vector.broadcast %cst_19 : f32 to vector<8x256xf32>
    %28 = arith.addf %27, %26 : vector<8x256xf32>
    %29 = arith.mulf %23, %28 : vector<8x256xf32>
    %30 = arith.mulf %21, %29 : vector<8x256xf32>
    %c0_20 = arith.constant 0 : index
    %c0_21 = arith.constant 0 : index
    %31 = vector.load %arg8[%c0_20, %c0_21] : memref<4x8xf32, #tpu.memory_space<vmem>>, vector<4x8xf32>
    %cst_22 = arith.constant dense<0.000000e+00> : vector<4x256xf32>
    %32 = tpu.matmul %31, %30, %cst_22 {dimension_numbers = #tpu.dot_dimension_numbers<[1], [0], [0], [1], [0, 0, 1, 1], [], []>} : vector<4x8xf32>, vector<8x256xf32>, vector<4x256xf32> -> vector<4x256xf32>
    %c0_23 = arith.constant 0 : index
    %c0_24 = arith.constant 0 : index
    %33 = vector.load %arg9[%c0_23, %c0_24] : memref<4x1xf32, #tpu.memory_space<vmem>>, vector<4x1xf32>
    %34 = vector.broadcast %33 : vector<4x1xf32> to vector<4x256xf32>
    %35 = arith.addf %32, %34 : vector<4x256xf32>
    %c0_25 = arith.constant 0 : index
    %c0_26 = arith.constant 0 : index
    %c0_27 = arith.constant 0 : index
    %36 = vector.load %arg10[%c0_25, %c0_26, %c0_27] : memref<1x4x256xf32, #tpu.memory_space<vmem>>, vector<1x4x256xf32>
    %37 = vector.shape_cast %36 : vector<1x4x256xf32> to vector<4x256xf32>
    %38 = vector.shape_cast %35 : vector<4x256xf32> to vector<1x4x256xf32>
    tpu.vector_store %arg10[%c0_25, %c0_26, %c0_27], %38 {strides = array<i32>} : memref<1x4x256xf32, #tpu.memory_space<vmem>>, vector<1x4x256xf32>,
    return
  }
  func.func @transform_0(%arg0: i32, %arg1: i32) -> (i32, i32, i32) {
    %c0_i32 = arith.constant 0 : i32
    %c0_i32_0 = arith.constant 0 : i32
    return %arg0, %c0_i32, %arg1 : i32, i32, i32
  }
  func.func @transform_1(%arg0: i32, %arg1: i32) -> (i32, i32, i32) {
    %c0_i32 = arith.constant 0 : i32
    %c0_i32_0 = arith.constant 0 : i32
    return %arg0, %c0_i32, %arg1 : i32, i32, i32
  }
  func.func @transform_2(%arg0: i32, %arg1: i32) -> (i32, i32) {
    %c0_i32 = arith.constant 0 : i32
    %c0_i32_0 = arith.constant 0 : i32
    %c0_i32_1 = arith.constant 0 : i32
    return %c0_i32, %c0_i32_0 : i32, i32
  }
  func.func @transform_3(%arg0: i32, %arg1: i32) -> (i32, i32) {
    %c0_i32 = arith.constant 0 : i32
    %c0_i32_0 = arith.constant 0 : i32
    %c0_i32_1 = arith.constant 0 : i32
    return %c0_i32, %c0_i32_0 : i32, i32
  }
  func.func @transform_4(%arg0: i32, %arg1: i32) -> (i32, i32) {
    %c0_i32 = arith.constant 0 : i32
    %c0_i32_0 = arith.constant 0 : i32
    %c0_i32_1 = arith.constant 0 : i32
    return %c0_i32, %c0_i32_0 : i32, i32
  }
  func.func @transform_5(%arg0: i32, %arg1: i32) -> (i32, i32) {
    %c0_i32 = arith.constant 0 : i32
    %c0_i32_0 = arith.constant 0 : i32
    %c0_i32_1 = arith.constant 0 : i32
    return %c0_i32, %c0_i32_0 : i32, i32
  }
  func.func @transform_6(%arg0: i32, %arg1: i32) -> (i32, i32) {
    %c0_i32 = arith.constant 0 : i32
    %c0_i32_0 = arith.constant 0 : i32
    %c0_i32_1 = arith.constant 0 : i32
    return %c0_i32, %c0_i32_0 : i32, i32
  }
  func.func @transform_7(%arg0: i32, %arg1: i32) -> (i32, i32) {
    %c0_i32 = arith.constant 0 : i32
    %c0_i32_0 = arith.constant 0 : i32
    %c0_i32_1 = arith.constant 0 : i32
    return %c0_i32, %c0_i32_0 : i32, i32
  }
  func.func @transform_8(%arg0: i32, %arg1: i32) -> (i32, i32, i32) {
    %c0_i32 = arith.constant 0 : i32
    %c0_i32_0 = arith.constant 0 : i32
    return %arg0, %c0_i32, %arg1 : i32, i32, i32
  }
}

</mosaic_0001>

<bundles_post_ra>
// kernel: tpu_custom_call.1
= control target key start
LH: loop header
LB: loop body
LE: loop exit
PB: predicated region body
PF: predicated region fallthrough
CT: control target
= control target key end

     0   :  { %13 = vsyncpa [#allocation3], 0  ;;  %s1109_s0 = inlined_call_operand.vmem [shape: f32[2,4,256], index: 0, kind: input, shape index: {}]   ;;  %s1110_s1 = inlined_call_operand.vmem [shape: f32[2,4,256], index: 1, kind: input, shape index: {}]   ;;  %s1111_s2 = inlined_call_operand.vmem [shape: f32[8,4], index: 2, kind: input, shape index: {}]   ;;  %s1112_s3 = inlined_call_operand.vmem [shape: f32[8,1], index: 3, kind: input, shape index: {}]   ;;  %s1113_s4 = inlined_call_operand.vmem [shape: f32[8,4], index: 4, kind: input, shape index: {}]   ;;  %s1114_s5 = inlined_call_operand.vmem [shape: f32[8,1], index: 5, kind: input, shape index: {}]   ;;  %s1115_s6 = inlined_call_operand.vmem [shape: f32[4,8], index: 6, kind: input, shape index: {}]   ;;  %s1116_s7 = inlined_call_operand.vmem [shape: f32[4,1], index: 7, kind: input, shape index: {}]   ;;  %s1117_s8 = inlined_call_operand.hbm [shape: f32[2,4,256], index: 8, kind: output, shape index: {}]  }
   0x1   :  { %15 = vsyncpa [#allocation3 + $0x1], 0  ;;  %s989_s27 = smov 0   ;;  %s991_s28 = smov 0  }
   0x2   :  { %s993_s29 = smov 0   ;;  %s995_s30 = smov 0  }
   0x3   :  { %s997_s9 = smov 0   ;;  %s999_s10 = smov 0  }
   0x4 LB: > { %s769_s11 = sadd.s32 4294967295, %s939_s10   ;;  %s770_s12 = sadd.s32 4294967294, %s939_s10   ;;  %s939_s10 = sphi %s999_s10, %s21_s10   ;;  %s935_s9 = sphi %s997_s9, %s1124_s9   ;;  %s931_s30 = sphi %s995_s30, %s1123_s30   ;;  %s927_s29 = sphi %s993_s29, %s1122_s29   ;;  %s923_s28 = sphi %s991_s28, %s1121_s28   ;;  %s919_s27 = sphi %s989_s27, %s1120_s27  }
   0x5   : > { %s33_s13 = sadd.s32 1, %s935_s9  ;;  %s224_s14 = sadd.s32 1, %s927_s29 }
   0x6   : > { %p35_p0 = scmp.ge.s32.totalorder %s33_s13, 2  ;;  %p234_p1 = scmp.ne.s32.totalorder %s927_s29, %s923_s28 }
   0x7   : > { %p235_p2 = scmp.eq.s32.totalorder %s769_s11, 1  ;;  %p240_p3 = scmp.ne.s32.totalorder %s923_s28, %s919_s27 }
   0x8   : > { %s1126_s13 = smov (%p35_p0, %s33_s13), 0  ;;  %p241_p5 = scmp.eq.s32.totalorder %s770_s12, 1 }
   0x9   : > { %p1029_p4 = por %p235_p2, %p234_p1  ;;  %s219_s16 = ssub.s32 %s935_s9, %s1126_s13 }
   0xa   : > { %p773_p6 = scmp.ge.s32.totalorder %s939_s10, 1  ;;  %p222_p7 = scmp.eq.s32.totalorder %s219_s16, 0 }
   0xb   : > { %p1036_p8 = por %p241_p5, %p240_p3  ;;  %p303_p9 = scmp.lt.s32.totalorder %s939_s10, 3 }
   0xc   : > { %s1042_s18 = scalar_select %p222_p7, %s927_s29, %s224_s14  }
   0xd   : > { %p304_p10 = pnand %p773_p6, %p303_p9 }
   0xe   : > { %p351_p11 = scmp.lt.s32.totalorder (!%p304_p10), %s931_s30, 1  ;;  %s793_s14 = sshll.u32 (!%p304_p10), %s931_s30, 7 }
   0xf   : > { %307 = sbr.rel (%p304_p10) target bundleno = 463 (0x1cf), region = 52  ;;  %s673_s23 = scalar_lea.hbm (!%p304_p10), %s1117_s8, %s793_s14 }
  0x10   : > { %s943_s25 = smov (!%p304_p10), [#allocation2]  }
  0x11   : > { %s867_s26 = sshll.u32 (!%p304_p10), %s943_s25, 4  ;;  %s868_s26 = int_to_ptr.vmem [resolvable:$false] %s867_s26 }
  0x14   : > { %v941_v0 = vmov 0.0   ;;  %v374_v1 = vld [vmem:[%s1112_s3] sm:$0xff]  ;;  %s352_s21 = scalar_select %p351_p11, %s931_s30, 1  ;;  %v942_v2 = vmov 0   ;;  %vm386_vm0 = vcmask 1043456   ;;  %vm382_vm1 = vcmask 31744  }
  0x15   : > { %455 = vmatprep.mubr.f32.mxu0 %v941_v0  ;;  %542 = vmatprep.mubr.f32.mxu1 %v941_v0  ;;  %v463_v3 = vld [vmem:[%s1114_s5] sm:$0xff]  ;;  %vm578_vm2 = vcmask 64512   ;;  %s869_s30 = scalar_lea.vmem %s868_s26, 256 }
  0x16   : > { %851 = vset.pattern.permute.xlu0 %v942_v2  ;;  %852 = vset.pattern.permute.xlu1 %v942_v2  ;;  %s791_s22 = sshll.u32 %s352_s21, 3  ;;  %v373_v8 = vld [vmem:[%s1111_s2] sm:$0xff] }
  0x17   : > { %377 = vperm.xlu0 %851, %v374_v1   ;;  %s358_s11 = scalar_lea.vmem %s1109_s0, %s791_s22  ;;  %s368_s16 = scalar_lea.vmem %s1110_s1, %s791_s22  ;;  %v462_v9 = vld [vmem:[%s1113_s4] sm:$0xff] }
  0x18   : > { %v371_v4 = vld [vmem:[%s358_s11] sm:$0xff]  ;;  %s347_s11 = sand.u32 1, %s923_s28  }
  0x19   : > { %v372_v5 = vld [vmem:[%s368_s16] sm:$0xff]  ;;  %v381_v6 = vcombine.high %v371_v4, %v371_v4  ;;  %s774_s12 = sshll.u32 %s347_s11, 3  ;;  %s659_s22 = scalar_lea.sflag [#allocation3], %s347_s11 }
  0x1a   : > { %v470_v7 = vcombine.high %v372_v5, %v372_v5  ;;  %v572_v10 = vld [vmem:[%s1116_s7] sm:$0xf]  ;;  %s349_s16 = scalar_lea.vmem [#allocation2], %s774_s12 }
  0x1b   : > { %466 = vperm.xlu0 %851, %v463_v3   ;;  %779 = vmatprep.subr.msk.mxu0 %vm386_vm0, %v381_v6  ;;  %v571_v43 = vld [vmem:[%s1115_s6] sm:$0xf]  ;;  %s675_s19 = sshll.u32 %s349_s16, 4  ;;  %s676_s19 = int_to_ptr.vmem [resolvable:$true] %s675_s19 }
  0x1c   : > { %782 = vmatprep.subr.msk.mxu1 %vm386_vm0, %v470_v7  ;;  %780 = vmatpush1.msk.msra.mxu0 %vm386_vm0, %v371_v4  ;;  %s863_s24 = scalar_lea.vmem %s676_s19, 128  ;;  %p870_p1 = scmp.lt.s32.totalorder %s676_s19, %s868_s26 }
  0x1d   : > { %783 = vmatpush1.msk.msra.mxu1 %vm386_vm0, %v372_v5  ;;  %781 = vmatmul.mubr.msk.f32.vlgmr.msra.gmra.mxu0 %vm382_vm1, %v373_v8  ;;  %p864_p12 = scmp.ne.s32.totalorder %s676_s19, %s863_s24  ;;  %p871_p2 = scmp.lt.s32.totalorder %s869_s30, %s863_s24 }
  0x1e   : > { %784 = vmatmul.mubr.msk.f32.vlgmr.msra.gmra.mxu1 %vm382_vm1, %v462_v9  ;;  %646 = vmatprep.mubr.f32.mxu0 %v941_v0 }
  0x1f   : > { %575 = vperm.xlu1 %852, %v572_v10   ;;  %p865_p13 = pnand %p864_p12, %p1029_p4  ;;  %p872_p3 = por %p871_p2, %p870_p1 }
  0x21   : > { %p866_p0 = pneg %p865_p13 }
  0x23   : > { %p873_p5 = pnand %p872_p3, %p866_p0 }
  0x92   : > { %v378_v11 = vpop.permute.xlu0 %377 }
  0x96   : > { %v467_v12 = vpop.permute.xlu0 %466 }
  0x9a   : > { %v576_v45 = vpop.permute.xlu1 %575 }
  0xdd   : > { %v457_v13 = vpop.f32.mrf.mxu0 }
  0xde   : > { %v544_v14 = vpop.f32.mrf.mxu1  ;;  %v458_v15 = vadd.f32 %v457_v13, %v378_v11 }
  0xdf   : > { %v545_v16 = vadd.f32 %v544_v14, %v467_v12  ;;  %v459_v17 = vpop.f32.mrf.mxu0 }
  0xe0   : > { %v546_v18 = vpop.f32.mrf.mxu1  ;;  %v551_v19 = vmul.f32 0.70710677, %v458_v15  ;;  %v460_v21 = vadd.f32 %v459_v17, %v378_v11  ;;  %v549_v31 = vmul.f32 0.5, %v458_v15 }
  0xe1   : > { %v561_v20 = vmul.f32 0.70710677, %v545_v16  ;;  %v547_v22 = vadd.f32 %v546_v18, %v467_v12  ;;  %v559_v32 = vmul.f32 0.5, %v545_v16 }
  0xe2   : > { %855 = verf.f32 %v551_v19  ;;  %v552_v23 = vmul.f32 0.70710677, %v460_v21  ;;  %v550_v33 = vmul.f32 0.5, %v460_v21 }
  0xe3   : > { %857 = verf.f32 %v561_v20  ;;  %v562_v24 = vmul.f32 0.70710677, %v547_v22  ;;  %v560_v35 = vmul.f32 0.5, %v547_v22 }
  0xe4   : > { %859 = verf.f32 %v552_v23 }
  0xe5   : > { %861 = verf.f32 %v562_v24 }
  0xef   : > { %v856_v25 = vpop.eup %855 }
  0xf0   : > { %v858_v26 = vpop.eup %857  ;;  %v555_v27 = vadd.f32 1.0, %v856_v25 }
  0xf1   : > { %v565_v28 = vadd.f32 1.0, %v858_v26  ;;  %v860_v29 = vpop.eup %859 }
  0xf2   : > { %v862_v30 = vpop.eup %861  ;;  %v556_v34 = vadd.f32 1.0, %v860_v29  ;;  %v557_v37 = vmul.f32 %v555_v27, %v549_v31 }
  0xf3   : > { %v566_v36 = vadd.f32 1.0, %v862_v30  ;;  %v567_v38 = vmul.f32 %v565_v28, %v559_v32 }
  0xf4   : > { %v558_v39 = vmul.f32 %v556_v34, %v550_v33 }
  0xf5   : > { %v568_v40 = vmul.f32 %v566_v36, %v560_v35  ;;  %v569_v42 = vmul.f32 %v567_v38, %v557_v37 }
  0xf7   : > { %v570_v41 = vmul.f32 %v568_v40, %v558_v39 }
  0xf9   : > { %612 = vmatprep.subr.mxu0 %v570_v41 }
  0xfa   : > { %613 = vmatpush1.msra.mxu0 %v569_v42 }
  0xfb   : > { %785 = vmatmul.mubr.msk.f32.vlgmr.msra.gmra.mxu0 %vm578_vm2, %v571_v43 }
 0x1bb   : > { %v648_v44 = vpop.f32.mrf.mxu0 }
 0x1bc   : > { %v649_v47 = vadd.f32 %v648_v44, %v576_v45 }
 0x1bd   : > { %v650_v46 = vpop.f32.mrf.mxu0 }
 0x1be   : > { %v651_v48 = vadd.f32 %v650_v46, %v576_v45 }
 0x1c0   : > { %v655_v49 = vcombine.low %v649_v47, %v651_v48 }
 0x1c2   : > { %657 = vst [vmem:[%s349_s16] sm:$0xff] %v655_v49 }
 0x1c3   : > { %876 = shalt.err (!%p873_p5)
}
 0x1c4   : > { %s877_s12 = scalar_lea.hbm %s673_s23, 128  ;;  %s881_s16 = scalar_lea.hbm %s1117_s8, 256 }
 0x1c5   : > { %p878_p6 = scmp.ne.s32.totalorder %s673_s23, %s877_s12  ;;  %p882_p10 = scmp.lt.s32.totalorder %s673_s23, %s1117_s8 }
 0x1c6   : > { %p883_p11 = scmp.lt.s32.totalorder %s881_s16, %s877_s12 }
 0x1c7   : > { %p879_p7 = pnand %p878_p6, %p1029_p4 }
 0x1c8   : > { %p884_p12 = por %p883_p11, %p882_p10 }
 0x1c9   : > { %p880_p9 = pneg %p879_p7 }
 0x1cb   : > { %p885_p13 = pnand %p884_p12, %p880_p9 }
 0x1cd   : > { %888 = shalt.err (!%p885_p13)
}
 0x1ce   : > { %794 = dma.vmem_to_hbm [thread:$0]  (%p1029_p4), %s676_s19, 128, %s673_s23, %s659_s22  }
 0x1cf PF: > { %p800_p0 = scmp.ge.s32.totalorder %s939_s10, 2  ;;  %s687_s24 = sand.u32 1, %s919_s27  }
 0x1d0   : > { %s688_s25 = scalar_lea.sflag [#allocation3], %s687_s24 }
 0x1d1   : > { %p797_p1 = pnand %p800_p0, %p1036_p8 }
 0x1d3   : > { %p798_p2 = pneg %p797_p1 }
 0x1d5   : > { %914 = dma.done.wait (%p798_p2), %s688_s25, 128  }
 0x1d6   : > { %916 = vsyncadd (%p798_p2), %s688_s25, 4294967168  ;;  %s21_s10 = sadd.s32 1, %s939_s10   ;;  %s1120_s27 = smov %s923_s28 }
 0x1d7   : > { %p18_p3 = scmp.ge.s32.totalorder %s21_s10, 4   ;;  %s1121_s28 = smov %s927_s29 }
 0x1d8   : > { %s1122_s29 = smov %s1042_s18  ;;  %s1123_s30 = smov %s935_s9 }
 0x1d9   : > { %s1124_s9 = smov %s1126_s13  ;;  %20 = sbr.rel (!%p18_p3) target bundleno = 4 (0x4), region = 90 }
 0x1de   :  { %693 = vsyncpa [#allocation3], 1 }
 0x1df   :  { %695 = vsyncpa [#allocation3 + $0x1], 1 }

</bundles_post_ra>
